<compile_context>
chip_gen: v7x
topology: tpu7x:2x2x1
jax: 0.10.0
libtpu: 0.0.40
codegen_flags: <defaults>
</compile_context>

<pallas_src>
import jax
import jax.numpy as jnp
from jax.experimental import pallas as pl
from jax.experimental.pallas import tpu as pltpu


def _round_up(x, m):
    return (x + m - 1) // m * m


# ----------------------------------------------------------------------------
# Pallas kernel: fused im2col-GEMM + folded BatchNorm + ReLU + 2x2 MaxPool
# ----------------------------------------------------------------------------
def conv_bn_relu_pool_kernel(p_ref, w_ref, b_ref, o_ref):
    # p_ref: (4, TM, Kp)  bf16  pool-parity im2col rows (parity-major)
    # w_ref: (Kp, Cout)   bf16  conv weight with BN scale folded into columns
    # b_ref: (1, Cout)    f32   folded bias = (conv_b - mean) * scale + beta
    # o_ref: (TM, Cout)   bf16  pooled output block
    tm, cout = o_ref.shape
    kp = p_ref.shape[2]
    # Single MXU pass over all 4*TM rows (layout-free merge of leading dims).
    lhs = p_ref[...].reshape(4 * tm, kp)
    z = jnp.dot(lhs, w_ref[...], preferred_element_type=jnp.float32)  # (4*TM, Cout) f32
    z = z.reshape(4, tm, cout)
    # 2x2 max-pool == max over the 4 parity slabs; then bias + ReLU (hoisted, exact).
    m = jnp.maximum(jnp.maximum(z[0], z[1]), jnp.maximum(z[2], z[3]))
    o_ref[...] = jnp.maximum(m + b_ref[...], 0.0).astype(o_ref.dtype)


def conv_bn_relu_pool(patches, w2, bias, tm):
    _, r_pad, k_pad = patches.shape
    cout = w2.shape[1]
    grid = (r_pad // tm,)
    # VMEM budget derived from the actual (double-buffered) block sizes + headroom.
    vmem = 2 * (4 * tm * k_pad * 2 + k_pad * cout * 2 + tm * cout * 2 + cout * 4)
    vmem = int(min(max(vmem + (8 << 20), 16 << 20), 64 << 20))
    return pl.pallas_call(
        conv_bn_relu_pool_kernel,
        out_shape=jax.ShapeDtypeStruct((r_pad, cout), jnp.bfloat16),
        grid_spec=pltpu.PrefetchScalarGridSpec(
            num_scalar_prefetch=0,
            grid=grid,
            in_specs=[
                pl.BlockSpec((4, tm, k_pad), lambda i: (0, i, 0)),
                pl.BlockSpec((k_pad, cout), lambda i: (0, 0)),  # weight stays resident
                pl.BlockSpec((1, cout), lambda i: (0, 0)),
            ],
            out_specs=pl.BlockSpec((tm, cout), lambda i: (i, 0)),
        ),
        compiler_params=pltpu.CompilerParams(
            dimension_semantics=("parallel",),
            vmem_limit_bytes=vmem,
        ),
    )(patches, w2, bias)


# ----------------------------------------------------------------------------
# Plain-JAX glue: pool-parity im2col (layout plumbing only, no conv FLOPs)
# ----------------------------------------------------------------------------
def build_pool_parity_patches(x_nhwc):
    """x: (N, H, W, Cin), H and W even -> (4, N*(H//2)*(W//2), 9*Cin)."""
    n, h, w, cin = x_nhwc.shape
    hp, wp = h // 2, w // 2
    xp = jnp.pad(x_nhwc, ((0, 0), (1, 1), (1, 1), (0, 0)))  # conv padding=1
    # 9-tap im2col at full conv resolution (K ordering (ky, kx, cin) matches
    # w.reshape(9*Cin, Cout)).
    cols = jnp.concatenate(
        [xp[:, ky:ky + h, kx:kx + w, :] for ky in range(3) for kx in range(3)],
        axis=-1)                                          # (N, H, W, 9*Cin)
    # Pool-offset (parity) decomposition: 4 strided slices.
    par = jnp.stack([cols[:, r::2, s::2, :] for r in (0, 1) for s in (0, 1)],
                    axis=0)                               # (4, N, Hp, Wp, 9*Cin)
    return par.reshape(4, n * hp * wp, 9 * cin)


def conv_block(x_nhwc, p, eps=1e-5):
    """One Conv3x3(pad=1) + BN(eval) + ReLU + MaxPool2x2 block. Returns bf16 NHWC."""
    n, h, w, cin = x_nhwc.shape
    cout = p["w"].shape[-1]
    hp, wp = h // 2, w // 2
    m = hp * wp
    r = n * m
    k = 9 * cin

    # Fold BN (eval mode): scale into the weight columns, everything else into bias.
    scale = p["gamma"] / jnp.sqrt(p["var"] + eps)
    bias = ((p["b"] - p["mean"]) * scale + p["beta"]).astype(jnp.float32)
    w2 = p["w"].reshape(k, cout) * scale[None, :]

    k_pad = _round_up(k, 128)                 # lane-align the contraction axis
    tm = min(256, _round_up(r, 8))            # row tile (sublane aligned)
    r_pad = _round_up(r, tm)

    patches = build_pool_parity_patches(x_nhwc.astype(jnp.bfloat16))
    patches = jnp.pad(patches, ((0, 0), (0, r_pad - r), (0, k_pad - k)))
    w2 = jnp.pad(w2, ((0, k_pad - k), (0, 0))).astype(jnp.bfloat16)

    y = conv_bn_relu_pool(patches, w2, bias.reshape(1, cout), tm)   # (r_pad, Cout) bf16
    return y[:r].reshape(n, hp, wp, cout)


# ----------------------------------------------------------------------------
# Parameters (deterministic, synthetic) and forward pass
# ----------------------------------------------------------------------------
def init_layer(key, cin, cout):
    kw, kb, kg, kbe, km, kv = jax.random.split(key, 6)
    return dict(
        w=jax.random.normal(kw, (3, 3, cin, cout), jnp.float32)
        * (1.0 / jnp.sqrt(9.0 * cin)),
        b=0.01 * jax.random.normal(kb, (cout,), jnp.float32),
        gamma=1.0 + 0.1 * jax.random.normal(kg, (cout,), jnp.float32),
        beta=0.1 * jax.random.normal(kbe, (cout,), jnp.float32),
        mean=0.1 * jax.random.normal(km, (cout,), jnp.float32),
        var=jnp.abs(jax.random.normal(kv, (cout,), jnp.float32)) + 0.5,
    )


def cnn_baseline_forward(x_nchw, params):
    x = jnp.transpose(x_nchw, (0, 2, 3, 1))       # NCHW -> NHWC
    for p in params:
        x = conv_block(x, p)
    x = x.astype(jnp.float32)
    return jnp.transpose(x, (0, 3, 1, 2))         # NHWC -> NCHW (match PyTorch)


if __name__ == "__main__":
    key = jax.random.PRNGKey(0)
    k_x, *k_layers = jax.random.split(key, 6)
    channel_plan = [(3, 64), (64, 128), (128, 256), (256, 512), (512, 512)]
    params = [init_layer(k, ci, co) for k, (ci, co) in zip(k_layers, channel_plan)]

    # Small CIFAR-like input, NCHW as in the PyTorch module (32x32 survives 5 pools).
    x = jax.random.normal(k_x, (2, 3, 32, 32), jnp.float32)

    out = cnn_baseline_forward(x, params)
    out = jax.block_until_ready(out)
    assert out.shape == (2, 512, 1, 1), out.shape
    assert bool(jnp.all(jnp.isfinite(out)))
    print("KERNEL_OK")
</pallas_src>

<mosaic_0001>
module attributes {stable_mosaic.version = 11 : i64} {
  func.func @conv_bn_relu_pool_kernel(%arg0: i32, %arg1: memref<4x256x128xbf16, #tpu.memory_space<vmem>>, %arg2: memref<128x64xbf16, #tpu.memory_space<vmem>>, %arg3: memref<1x64xf32, #tpu.memory_space<vmem>>, %arg4: memref<256x64xbf16, #tpu.memory_space<vmem>>) attributes {dimension_semantics = [#tpu.dimension_semantics<parallel>], iteration_bounds = array<i64: 2>, scalar_prefetch = 0 : i64, scratch_operands = 0 : i64, tpu.core_type = #tpu.core_type<tc>, window_params = [{transform_indices = @transform_0, window_bounds = array<i64: 4, 256, 128>}, {pipeline_mode = #tpu.pipeline_mode<synchronous>, transform_indices = @transform_1, window_bounds = array<i64: 128, 64>}, {pipeline_mode = #tpu.pipeline_mode<synchronous>, transform_indices = @transform_2, window_bounds = array<i64: 1, 64>}, {transform_indices = @transform_3, window_bounds = array<i64: 256, 64>}]} {
    %c0 = arith.constant 0 : index
    %c0_0 = arith.constant 0 : index
    %c0_1 = arith.constant 0 : index
    %0 = vector.load %arg1[%c0, %c0_0, %c0_1] : memref<4x256x128xbf16, #tpu.memory_space<vmem>>, vector<4x256x128xbf16>
    %1 = vector.shape_cast %0 : vector<4x256x128xbf16> to vector<1024x128xbf16>
    %c0_2 = arith.constant 0 : index
    %c0_3 = arith.constant 0 : index
    %2 = vector.load %arg2[%c0_2, %c0_3] : memref<128x64xbf16, #tpu.memory_space<vmem>>, vector<128x64xbf16>
    %cst = arith.constant dense<0.000000e+00> : vector<1024x64xf32>
    %3 = tpu.matmul %1, %2, %cst {dimension_numbers = #tpu.dot_dimension_numbers<[1], [0], [0], [1], [0, 0, 1, 1], [], []>} : vector<1024x128xbf16>, vector<128x64xbf16>, vector<1024x64xf32> -> vector<1024x64xf32>
    %4 = vector.shape_cast %3 : vector<1024x64xf32> to vector<4x256x64xf32>
    %5 = vector.extract_strided_slice %4 {offsets = [0, 0, 0], sizes = [1, 256, 64], strides = [1, 1, 1]} : vector<4x256x64xf32> to vector<1x256x64xf32>
    %6 = vector.shape_cast %5 : vector<1x256x64xf32> to vector<256x64xf32>
    %7 = vector.extract_strided_slice %4 {offsets = [1, 0, 0], sizes = [1, 256, 64], strides = [1, 1, 1]} : vector<4x256x64xf32> to vector<1x256x64xf32>
    %8 = vector.shape_cast %7 : vector<1x256x64xf32> to vector<256x64xf32>
    %9 = arith.maximumf %6, %8 : vector<256x64xf32>
    %10 = vector.extract_strided_slice %4 {offsets = [2, 0, 0], sizes = [1, 256, 64], strides = [1, 1, 1]} : vector<4x256x64xf32> to vector<1x256x64xf32>
    %11 = vector.shape_cast %10 : vector<1x256x64xf32> to vector<256x64xf32>
    %12 = vector.extract_strided_slice %4 {offsets = [3, 0, 0], sizes = [1, 256, 64], strides = [1, 1, 1]} : vector<4x256x64xf32> to vector<1x256x64xf32>
    %13 = vector.shape_cast %12 : vector<1x256x64xf32> to vector<256x64xf32>
    %14 = arith.maximumf %11, %13 : vector<256x64xf32>
    %15 = arith.maximumf %9, %14 : vector<256x64xf32>
    %c0_4 = arith.constant 0 : index
    %c0_5 = arith.constant 0 : index
    %16 = vector.load %arg3[%c0_4, %c0_5] : memref<1x64xf32, #tpu.memory_space<vmem>>, vector<1x64xf32>
    %17 = vector.broadcast %16 : vector<1x64xf32> to vector<256x64xf32>
    %18 = arith.addf %15, %17 : vector<256x64xf32>
    %cst_6 = arith.constant 0.000000e+00 : f32
    %19 = vector.broadcast %cst_6 : f32 to vector<256x64xf32>
    %20 = arith.maximumf %18, %19 : vector<256x64xf32>
    %21 = arith.truncf %20 : vector<256x64xf32> to vector<256x64xbf16>
    %c0_7 = arith.constant 0 : index
    %c0_8 = arith.constant 0 : index
    %22 = vector.load %arg4[%c0_7, %c0_8] : memref<256x64xbf16, #tpu.memory_space<vmem>>, vector<256x64xbf16>
    tpu.vector_store %arg4[%c0_7, %c0_8], %21 {strides = array<i32>} : memref<256x64xbf16, #tpu.memory_space<vmem>>, vector<256x64xbf16>,
    return
  }
  func.func @transform_0(%arg0: i32) -> (i32, i32, i32) {
    %c0_i32 = arith.constant 0 : i32
    %c0_i32_0 = arith.constant 0 : i32
    %c0_i32_1 = arith.constant 0 : i32
    return %c0_i32, %arg0, %c0_i32_0 : i32, i32, i32
  }
  func.func @transform_1(%arg0: i32) -> (i32, i32) {
    %c0_i32 = arith.constant 0 : i32
    %c0_i32_0 = arith.constant 0 : i32
    %c0_i32_1 = arith.constant 0 : i32
    return %c0_i32, %c0_i32_0 : i32, i32
  }
  func.func @transform_2(%arg0: i32) -> (i32, i32) {
    %c0_i32 = arith.constant 0 : i32
    %c0_i32_0 = arith.constant 0 : i32
    %c0_i32_1 = arith.constant 0 : i32
    return %c0_i32, %c0_i32_0 : i32, i32
  }
  func.func @transform_3(%arg0: i32) -> (i32, i32) {
    %c0_i32 = arith.constant 0 : i32
    %c0_i32_0 = arith.constant 0 : i32
    return %arg0, %c0_i32 : i32, i32
  }
}

</mosaic_0001>

<bundles_post_ra>
// kernel: tpu_custom_call.1
= control target key start
LH: loop header
LB: loop body
LE: loop exit
PB: predicated region body
PF: predicated region fallthrough
CT: control target
= control target key end

     0   :  { %8 = vsyncpa [#allocation3], 0  ;;  %s2775_s0 = inlined_call_operand.hbm [shape: bf16[4,512,128], index: 0, kind: input, shape index: {}]   ;;  %s2776_s1 = inlined_call_operand.vmem [shape: bf16[128,64], index: 1, kind: input, shape index: {}]   ;;  %s2777_s2 = inlined_call_operand.vmem [shape: f32[1,64], index: 2, kind: input, shape index: {}]   ;;  %s2778_s3 = inlined_call_operand.vmem [shape: bf16[512,64], index: 3, kind: output, shape index: {}]  }
   0x1   :  { %10 = vsyncpa [#allocation3 + $0x1], 0  ;;  %s2301_s12 = smov 0   ;;  %s2303_s13 = smov 0  }
   0x2   :  { %s2305_s14 = smov 0   ;;  %s2307_s15 = smov 0  }
   0x3 LB: > { %s1735_s16 = sadd.s32 4294967295, %s2273_s15   ;;  %s2321_s17 = sadd.s32 1, %s2273_s15   ;;  %s2273_s15 = sphi %s2307_s15, %s2816_s15   ;;  %s2269_s14 = sphi %s2305_s14, %s2815_s14   ;;  %s2265_s13 = sphi %s2303_s13, %s2814_s13   ;;  %s2261_s12 = sphi %s2301_s12, %s2813_s12  }
   0x4   : > { %s20_s18 = ssub.s32 %s2273_s15, %s2321_s17  ;;  %s23_s19 = sadd.s32 1, %s2269_s14 }
   0x5   : > { %p21_p0 = scmp.eq.s32.totalorder %s20_s18, 0  ;;  %p30_p1 = scmp.ne.s32.totalorder %s2269_s14, %s2265_s13 }
   0x6   : > { %p31_p2 = scmp.eq.s32.totalorder %s2273_s15, 0  ;;  %p36_p3 = scmp.ne.s32.totalorder %s2265_s13, %s2261_s12 }
   0x7   : > { %s2331_s20 = scalar_select %p21_p0, %s2269_s14, %s23_s19  }
   0x8   : > { %p2333_p4 = por %p31_p2, %p30_p1  ;;  %p37_p5 = scmp.eq.s32.totalorder %s1735_s16, 0 }
   0x9   : > { %p1738_p7 = scmp.ge.s32.totalorder %s2273_s15, 2 }
   0xa   : > { %p2339_p6 = por %p37_p5, %p36_p3 }
   0xb   : > { %130 = sbr.rel (%p1738_p7) target bundleno = 31 (0x1f), region = 24 }
  0x12   : > { %s134_s23 = sand.u32 1, %s2269_s14   ;;  %s1855_s24 = sshll.u32 %s2273_s15, 11 }
  0x13   : > { %s1739_s25 = sshll.u32 %s134_s23, 9  ;;  %s144_s28 = scalar_lea.hbm %s2775_s0, %s1855_s24 }
  0x14   : > { %s2120_s29 = scalar_select %p2333_p4, [#allocation0], [#allocation6] }
  0x15   : > { %s138_s30 = scalar_lea.vmem [#allocation2], %s1739_s25  ;;  %s2275_s6 = smov 4096  }
  0x16   : > { %s157_s4 = sshll.u32 %s138_s30, 4  ;;  %s149_s5 = sld [smem:[%s2120_s29]]   ;;  %s158_s4 = int_to_ptr.vmem [resolvable:$true] %s157_s4 }
  0x17   : > { %2121 = sst [smem:[#allocation5]] (%p2333_p4), %s2275_s6  ;;  %s2276_s7 = smov 2048  }
  0x18   : > { %2122 = sst [smem:[#allocation5 + $0x1]] (%p2333_p4), %s2276_s7  ;;  %s2277_s8 = smov 32  }
  0x19   : > { %2123 = sst [smem:[#allocation5 + $0x2]] (%p2333_p4), %s2277_s8  ;;  %s2278_s9 = smov 64  }
  0x1a   : > { %2124 = sst [smem:[#allocation5 + $0x3]] (%p2333_p4), %s2278_s9  ;;  %s2279_s11 = smov 4  }
  0x1b   : > { %2125 = sst [smem:[#allocation5 + $0x4]] (%p2333_p4), %s2278_s9  ;;  %s135_s18 = scalar_lea.sflag [#allocation3], %s134_s23 }
  0x1c   : > { %s1742_s10 = sshll.u32 %s149_s5, 26  ;;  %2126 = sst [smem:[#allocation5 + $0x5]] (%p2333_p4), %s2279_s11 }
  0x1d   : > { %s1743_s12 = sadd.s32 134217728, %s1742_s10  ;;  %s2280_s19 = smov [#allocation4]  }
  0x1e   : > { %2127 = dma.general (%p2333_p4), %s144_s28, 8192, %s158_s4, %s135_s18, %s2280_s19, [#allocation5], %s1743_s12, 0  }
  0x1f PF: > { %p1744_p8 = scmp.ge.s32.totalorder %s2273_s15, 1  ;;  %p178_p9 = scmp.lt.s32.totalorder %s2273_s15, 3 }
  0x21   : > { %p179_p10 = pnand %p1744_p8, %p178_p9 }
  0x23   : > { %182 = sbr.rel (%p179_p10) target bundleno = 425 (0x1a9), region = 32 }
  0x2a   : > { %s184_s24 = sand.u32 1, %s2265_s13  }
  0x2b   : > { %s1745_s25 = sshll.u32 %s184_s24, 9  ;;  %s185_s26 = scalar_lea.sflag [#allocation3], %s184_s24 }
  0x2c   : > { %s2368_s27 = scalar_lea.vmem [#allocation2], %s1745_s25 }
  0x2d   : > { %2256 = dma.done.wait (%p2339_p6), %s185_s26, 8192  }
  0x2e   : > { %2258 = vsyncadd (%p2339_p6), %s185_s26, 4294959104  ;;  %v2167_v0 = vld [vmem:[%s2776_s1] sm:$0xff]   ;;  %v2168_v1 = vld [vmem:[%s2776_s1 + $0x8] sm:$0xff]   ;;  %s1746_s19 = sshll.u32 %s1735_s16, 5  ;;  %vm1635_vm0 = vcmask 519168  }
  0x2f   : > { %1960 = vmatprep.subr.bf16.mxu0 %v2167_v0  ;;  %2104 = vmatprep.subr.bf16.mxu1 %v2167_v0  ;;  %v2169_v2 = vld [vmem:[%s2776_s1 + $0x10] sm:$0xff]   ;;  %v2170_v3 = vld [vmem:[%s2776_s1 + $0x18] sm:$0xff]   ;;  %v2175_v4 = vld [vmem:[%s2368_s27] sm:$0xff]   ;;  %p213_p11 = scmp.lt.s32.totalorder %s1746_s19, 63 }
  0x30   : > { %1961 = vmatpush3.bf16.msra.mxu0 %v2167_v0  ;;  %2112 = vmatpush3.bf16.msra.mxu1 %v2167_v0  ;;  %v2176_v5 = vld [vmem:[%s2368_s27 + $0x100] sm:$0xff]   ;;  %v2172_v7 = vld [vmem:[%s2776_s1 + $0x28] sm:$0xff]   ;;  %v2173_v8 = vld [vmem:[%s2776_s1 + $0x30] sm:$0xff]  }
  0x31   : > { %1962 = vmatprep.subr.bf16.mxu0 %v2168_v1  ;;  %2105 = vmatprep.subr.bf16.mxu1 %v2168_v1  ;;  %v2171_v6 = vld [vmem:[%s2776_s1 + $0x20] sm:$0xff]   ;;  %v2174_v9 = vld [vmem:[%s2776_s1 + $0x38] sm:$0xff]   ;;  %v2177_v10 = vld [vmem:[%s2368_s27 + $0x8] sm:$0xff]   ;;  %s2818_s19 = smov (!%p213_p11, %s1746_s19), 63 }
  0x32   : > { %1976 = vmatprep.mubr.bf16.mxu0 %v2175_v4  ;;  %2040 = vmatprep.mubr.bf16.mxu1 %v2176_v5  ;;  %v2178_v11 = vld [vmem:[%s2368_s27 + $0x108] sm:$0xff]   ;;  %v2179_v12 = vld [vmem:[%s2368_s27 + $0x10] sm:$0xff]   ;;  %v2181_v14 = vld [vmem:[%s2368_s27 + $0x18] sm:$0xff]   ;;  %s1747_s15 = sshll.u32 %s2818_s19, 2 }
  0x33   : > { %v2180_v13 = vld [vmem:[%s2368_s27 + $0x110] sm:$0xff]   ;;  %v2182_v15 = vld [vmem:[%s2368_s27 + $0x118] sm:$0xff]   ;;  %v2183_v16 = vld [vmem:[%s2368_s27 + $0x20] sm:$0xff]  }
  0x34   : > { %1963 = vmatpush3.bf16.msra.mxu0 %v2168_v1  ;;  %2113 = vmatpush3.bf16.msra.mxu1 %v2168_v1  ;;  %v2184_v17 = vld [vmem:[%s2368_s27 + $0x120] sm:$0xff]   ;;  %v2185_v18 = vld [vmem:[%s2368_s27 + $0x28] sm:$0xff]   ;;  %v2187_v20 = vld [vmem:[%s2368_s27 + $0x30] sm:$0xff]  }
  0x35   : > { %1964 = vmatprep.subr.bf16.mxu0 %v2169_v2  ;;  %2106 = vmatprep.subr.bf16.mxu1 %v2169_v2  ;;  %v2186_v19 = vld [vmem:[%s2368_s27 + $0x128] sm:$0xff]   ;;  %v2188_v21 = vld [vmem:[%s2368_s27 + $0x130] sm:$0xff]   ;;  %v2189_v22 = vld [vmem:[%s2368_s27 + $0x38] sm:$0xff]  }
  0x36   : > { %v2190_v23 = vld [vmem:[%s2368_s27 + $0x138] sm:$0xff]   ;;  %v2191_v24 = vld [vmem:[%s2368_s27 + $0x40] sm:$0xff]   ;;  %v2193_v26 = vld [vmem:[%s2368_s27 + $0x48] sm:$0xff]  }
  0x37   : > { %v2192_v25 = vld [vmem:[%s2368_s27 + $0x140] sm:$0xff]   ;;  %v2194_v27 = vld [vmem:[%s2368_s27 + $0x148] sm:$0xff]   ;;  %v2195_v28 = vld [vmem:[%s2368_s27 + $0x50] sm:$0xff]  }
  0x38   : > { %1965 = vmatpush3.bf16.msra.mxu0 %v2169_v2  ;;  %2114 = vmatpush3.bf16.msra.mxu1 %v2169_v2  ;;  %v2196_v29 = vld [vmem:[%s2368_s27 + $0x150] sm:$0xff]   ;;  %v2197_v30 = vld [vmem:[%s2368_s27 + $0x58] sm:$0xff]   ;;  %v2199_v32 = vld [vmem:[%s2368_s27 + $0x60] sm:$0xff]  }
  0x39   : > { %1966 = vmatprep.subr.bf16.mxu0 %v2170_v3  ;;  %2107 = vmatprep.subr.bf16.mxu1 %v2170_v3  ;;  %v2198_v31 = vld [vmem:[%s2368_s27 + $0x158] sm:$0xff]   ;;  %v2200_v33 = vld [vmem:[%s2368_s27 + $0x160] sm:$0xff]   ;;  %v2201_v34 = vld [vmem:[%s2368_s27 + $0x68] sm:$0xff]  }
  0x3a   : > { %v2202_v35 = vld [vmem:[%s2368_s27 + $0x168] sm:$0xff]   ;;  %v2203_v36 = vld [vmem:[%s2368_s27 + $0x70] sm:$0xff]   ;;  %v2205_v38 = vld [vmem:[%s2368_s27 + $0x78] sm:$0xff]  }
  0x3b   : > { %v2204_v37 = vld [vmem:[%s2368_s27 + $0x170] sm:$0xff]   ;;  %v2206_v39 = vld [vmem:[%s2368_s27 + $0x178] sm:$0xff]   ;;  %v2207_v40 = vld [vmem:[%s2368_s27 + $0x80] sm:$0xff]  }
  0x3c   : > { %1967 = vmatpush3.bf16.msra.mxu0 %v2170_v3  ;;  %2115 = vmatpush3.bf16.msra.mxu1 %v2170_v3  ;;  %v2208_v41 = vld [vmem:[%s2368_s27 + $0x180] sm:$0xff]   ;;  %v2209_v42 = vld [vmem:[%s2368_s27 + $0x88] sm:$0xff]   ;;  %v2211_v44 = vld [vmem:[%s2368_s27 + $0x90] sm:$0xff]  }
  0x3d   : > { %1968 = vmatprep.subr.bf16.mxu0 %v2171_v6  ;;  %2108 = vmatprep.subr.bf16.mxu1 %v2171_v6  ;;  %v2210_v43 = vld [vmem:[%s2368_s27 + $0x188] sm:$0xff]   ;;  %v2212_v45 = vld [vmem:[%s2368_s27 + $0x190] sm:$0xff]   ;;  %v2213_v46 = vld [vmem:[%s2368_s27 + $0x98] sm:$0xff]  }
  0x3e   : > { %v2214_v47 = vld [vmem:[%s2368_s27 + $0x198] sm:$0xff]   ;;  %v2215_v48 = vld [vmem:[%s2368_s27 + $0xa0] sm:$0xff]   ;;  %v2217_v50 = vld [vmem:[%s2368_s27 + $0xa8] sm:$0xff]  }
  0x3f   : > { %v2216_v49 = vld [vmem:[%s2368_s27 + $0x1a0] sm:$0xff]   ;;  %v2218_v51 = vld [vmem:[%s2368_s27 + $0x1a8] sm:$0xff]   ;;  %v2219_v52 = vld [vmem:[%s2368_s27 + $0xb0] sm:$0xff]  }
  0x40   : > { %1969 = vmatpush3.bf16.msra.mxu0 %v2171_v6  ;;  %2116 = vmatpush3.bf16.msra.mxu1 %v2171_v6  ;;  %v2220_v53 = vld [vmem:[%s2368_s27 + $0x1b0] sm:$0xff]   ;;  %v2221_v54 = vld [vmem:[%s2368_s27 + $0xb8] sm:$0xff]   ;;  %v2223_v56 = vld [vmem:[%s2368_s27 + $0xc0] sm:$0xff]  }
  0x41   : > { %1970 = vmatprep.subr.bf16.mxu0 %v2172_v7  ;;  %2109 = vmatprep.subr.bf16.mxu1 %v2172_v7  ;;  %v2222_v55 = vld [vmem:[%s2368_s27 + $0x1b8] sm:$0xff]   ;;  %v2224_v57 = vld [vmem:[%s2368_s27 + $0x1c0] sm:$0xff]   ;;  %v2225_v58 = vld [vmem:[%s2368_s27 + $0xc8] sm:$0xff]  }
  0x42   : > { %v2226_v59 = vld [vmem:[%s2368_s27 + $0x1c8] sm:$0xff]   ;;  %v2227_v60 = vld [vmem:[%s2368_s27 + $0xd0] sm:$0xff]   ;;  %v2229_v62 = vld [vmem:[%s2368_s27 + $0xd8] sm:$0xff]  }
  0x43   : > { %v2228_v61 = vld [vmem:[%s2368_s27 + $0x1d0] sm:$0xff]   ;;  %v2230_v63 = vld [vmem:[%s2368_s27 + $0x1d8] sm:$0xff]   ;;  %v2231_v0 = vld [vmem:[%s2368_s27 + $0xe0] sm:$0xff]  }
  0x44   : > { %1971 = vmatpush3.bf16.msra.mxu0 %v2172_v7  ;;  %2117 = vmatpush3.bf16.msra.mxu1 %v2172_v7  ;;  %v2232_v1 = vld [vmem:[%s2368_s27 + $0x1e0] sm:$0xff]   ;;  %v2233_v2 = vld [vmem:[%s2368_s27 + $0xe8] sm:$0xff]   ;;  %v2235_v4 = vld [vmem:[%s2368_s27 + $0xf0] sm:$0xff]  }
  0x45   : > { %1972 = vmatprep.subr.bf16.mxu0 %v2173_v8  ;;  %2110 = vmatprep.subr.bf16.mxu1 %v2173_v8  ;;  %v2234_v3 = vld [vmem:[%s2368_s27 + $0x1e8] sm:$0xff]   ;;  %v2236_v5 = vld [vmem:[%s2368_s27 + $0x1f0] sm:$0xff]   ;;  %v2237_v6 = vld [vmem:[%s2368_s27 + $0xf8] sm:$0xff]  }
  0x46   : > { %v2238_v7 = vld [vmem:[%s2368_s27 + $0x1f8] sm:$0xff]   ;;  %s2611_s27 = scalar_lea.vmem %s2778_s3, %s1747_s15 }
  0x48   : > { %1973 = vmatpush3.bf16.msra.mxu0 %v2173_v8  ;;  %2118 = vmatpush3.bf16.msra.mxu1 %v2173_v8 }
  0x49   : > { %1974 = vmatprep.subr.bf16.mxu0 %v2174_v9  ;;  %2111 = vmatprep.subr.bf16.mxu1 %v2174_v9 }
  0x4c   : > { %1975 = vmatpush3.bf16.msra.mxu0 %v2174_v9  ;;  %2119 = vmatpush3.bf16.msra.mxu1 %v2174_v9 }
  0x4f   : > { %1977 = vmatmul.mubr.bf16.vlgmr.msra.gmra.mrb[0].mxu0 %v2177_v10  ;;  %2041 = vmatmul.mubr.bf16.vlgmr.msra.gmra.mrb[0].mxu1 %v2178_v11 }
  0x50   : > { %1980 = vmatprep.mubr.bf16.mxu0 %v2179_v12  ;;  %2044 = vmatprep.mubr.bf16.mxu1 %v2180_v13 }
  0x57   : > { %1981 = vmatmul.mubr.bf16.gmra.mrb[4].mxu0 %v2181_v14  ;;  %2045 = vmatmul.mubr.bf16.gmra.mrb[4].mxu1 %v2182_v15 }
  0x58   : > { %1984 = vmatprep.mubr.bf16.mxu0 %v2183_v16  ;;  %2048 = vmatprep.mubr.bf16.mxu1 %v2184_v17 }
  0x5f   : > { %1985 = vmatmul.mubr.bf16.gmra.mrb[8].mxu0 %v2185_v18  ;;  %2049 = vmatmul.mubr.bf16.gmra.mrb[8].mxu1 %v2186_v19 }
  0x60   : > { %1988 = vmatprep.mubr.bf16.mxu0 %v2187_v20  ;;  %2052 = vmatprep.mubr.bf16.mxu1 %v2188_v21 }
  0x67   : > { %1989 = vmatmul.mubr.bf16.gmra.mrb[12].mxu0 %v2189_v22  ;;  %2053 = vmatmul.mubr.bf16.gmra.mrb[12].mxu1 %v2190_v23 }
  0x68   : > { %1992 = vmatprep.mubr.bf16.mxu0 %v2191_v24  ;;  %2056 = vmatprep.mubr.bf16.mxu1 %v2192_v25 }
  0x6f   : > { %1993 = vmatmul.mubr.bf16.gmra.mrb[16].mxu0 %v2193_v26  ;;  %2057 = vmatmul.mubr.bf16.gmra.mrb[16].mxu1 %v2194_v27 }
  0x70   : > { %1996 = vmatprep.mubr.bf16.mxu0 %v2195_v28  ;;  %2060 = vmatprep.mubr.bf16.mxu1 %v2196_v29 }
  0x77   : > { %1997 = vmatmul.mubr.bf16.gmra.mrb[20].mxu0 %v2197_v30  ;;  %2061 = vmatmul.mubr.bf16.gmra.mrb[20].mxu1 %v2198_v31 }
  0x78   : > { %2000 = vmatprep.mubr.bf16.mxu0 %v2199_v32  ;;  %2064 = vmatprep.mubr.bf16.mxu1 %v2200_v33 }
  0x7f   : > { %2001 = vmatmul.mubr.bf16.gmra.mrb[24].mxu0 %v2201_v34  ;;  %2065 = vmatmul.mubr.bf16.gmra.mrb[24].mxu1 %v2202_v35 }
  0x80   : > { %2004 = vmatprep.mubr.bf16.mxu0 %v2203_v36  ;;  %2068 = vmatprep.mubr.bf16.mxu1 %v2204_v37 }
  0x87   : > { %2005 = vmatmul.mubr.bf16.gmra.mrb[28].mxu0 %v2205_v38  ;;  %2069 = vmatmul.mubr.bf16.gmra.mrb[28].mxu1 %v2206_v39 }
  0x88   : > { %2008 = vmatprep.mubr.bf16.mxu0 %v2207_v40  ;;  %2072 = vmatprep.mubr.bf16.mxu1 %v2208_v41 }
  0x8f   : > { %2009 = vmatmul.mubr.bf16.gmra.mrb[32].mxu0 %v2209_v42  ;;  %2073 = vmatmul.mubr.bf16.gmra.mrb[32].mxu1 %v2210_v43 }
  0x90   : > { %2012 = vmatprep.mubr.bf16.mxu0 %v2211_v44  ;;  %2076 = vmatprep.mubr.bf16.mxu1 %v2212_v45 }
  0x97   : > { %2013 = vmatmul.mubr.bf16.gmra.mrb[36].mxu0 %v2213_v46  ;;  %2077 = vmatmul.mubr.bf16.gmra.mrb[36].mxu1 %v2214_v47 }
  0x98   : > { %2016 = vmatprep.mubr.bf16.mxu0 %v2215_v48  ;;  %2080 = vmatprep.mubr.bf16.mxu1 %v2216_v49 }
  0x9f   : > { %2017 = vmatmul.mubr.bf16.gmra.mrb[40].mxu0 %v2217_v50  ;;  %2081 = vmatmul.mubr.bf16.gmra.mrb[40].mxu1 %v2218_v51 }
  0xa0   : > { %2020 = vmatprep.mubr.bf16.mxu0 %v2219_v52  ;;  %2084 = vmatprep.mubr.bf16.mxu1 %v2220_v53 }
  0xa7   : > { %2021 = vmatmul.mubr.bf16.gmra.mrb[44].mxu0 %v2221_v54  ;;  %2085 = vmatmul.mubr.bf16.gmra.mrb[44].mxu1 %v2222_v55 }
  0xa8   : > { %2024 = vmatprep.mubr.bf16.mxu0 %v2223_v56  ;;  %2088 = vmatprep.mubr.bf16.mxu1 %v2224_v57 }
  0xaf   : > { %2025 = vmatmul.mubr.bf16.gmra.mrb[48].mxu0 %v2225_v58  ;;  %2089 = vmatmul.mubr.bf16.gmra.mrb[48].mxu1 %v2226_v59 }
  0xb0   : > { %2028 = vmatprep.mubr.bf16.mxu0 %v2227_v60  ;;  %2092 = vmatprep.mubr.bf16.mxu1 %v2228_v61 }
  0xb7   : > { %2029 = vmatmul.mubr.bf16.gmra.mrb[52].mxu0 %v2229_v62  ;;  %2093 = vmatmul.mubr.bf16.gmra.mrb[52].mxu1 %v2230_v63 }
  0xb8   : > { %2032 = vmatprep.mubr.bf16.mxu0 %v2231_v0  ;;  %2096 = vmatprep.mubr.bf16.mxu1 %v2232_v1 }
  0xbf   : > { %2033 = vmatmul.mubr.bf16.gmra.mrb[56].mxu0 %v2233_v2  ;;  %2097 = vmatmul.mubr.bf16.gmra.mrb[56].mxu1 %v2234_v3 }
  0xc0   : > { %2036 = vmatprep.mubr.bf16.mxu0 %v2235_v4  ;;  %2100 = vmatprep.mubr.bf16.mxu1 %v2236_v5 }
  0xc7   : > { %2037 = vmatmul.mubr.bf16.gmra.mrb[60].mxu0 %v2237_v6  ;;  %2101 = vmatmul.mubr.bf16.gmra.mrb[60].mxu1 %v2238_v7 }
 0x122   : > { %v2462_v8 = vpop.f32.mrb[0].mxu0  ;;  %v2464_v9 = vpop.f32.mrb[0].mxu1 }
 0x123   : > { %v2466_v10 = vpop.f32.mrb[1].mxu0  ;;  %v2468_v11 = vpop.f32.mrb[1].mxu1 }
 0x124   : > { %v2470_v12 = vpop.f32.mrb[2].mxu0  ;;  %v2472_v13 = vpop.f32.mrb[2].mxu1 }
 0x125   : > { %v2474_v14 = vpop.f32.mrb[3].mxu0  ;;  %v2476_v15 = vpop.f32.mrb[3].mxu1 }
 0x12a   : > { %v2478_v16 = vpop.f32.mrb[4].mxu0  ;;  %v2480_v17 = vpop.f32.mrb[4].mxu1 }
 0x12b   : > { %v2482_v18 = vpop.f32.mrb[5].mxu0  ;;  %v2484_v19 = vpop.f32.mrb[5].mxu1 }
 0x12c   : > { %v2486_v20 = vpop.f32.mrb[6].mxu0  ;;  %v2488_v21 = vpop.f32.mrb[6].mxu1 }
 0x12d   : > { %v2490_v22 = vpop.f32.mrb[7].mxu0  ;;  %v2492_v23 = vpop.f32.mrb[7].mxu1 }
 0x132   : > { %v2494_v24 = vpop.f32.mrb[8].mxu0  ;;  %v2496_v25 = vpop.f32.mrb[8].mxu1 }
 0x133   : > { %v2498_v26 = vpop.f32.mrb[9].mxu0  ;;  %v2500_v27 = vpop.f32.mrb[9].mxu1 }
 0x134   : > { %v2502_v28 = vpop.f32.mrb[10].mxu0  ;;  %v2504_v29 = vpop.f32.mrb[10].mxu1 }
 0x135   : > { %v2506_v30 = vpop.f32.mrb[11].mxu0  ;;  %v2508_v31 = vpop.f32.mrb[11].mxu1 }
 0x13a   : > { %v2510_v32 = vpop.f32.mrb[12].mxu0  ;;  %v2512_v33 = vpop.f32.mrb[12].mxu1 }
 0x13b   : > { %v2514_v34 = vpop.f32.mrb[13].mxu0  ;;  %v2516_v35 = vpop.f32.mrb[13].mxu1 }
 0x13c   : > { %v2518_v36 = vpop.f32.mrb[14].mxu0  ;;  %v2520_v37 = vpop.f32.mrb[14].mxu1 }
 0x13d   : > { %v2522_v38 = vpop.f32.mrb[15].mxu0  ;;  %v2524_v39 = vpop.f32.mrb[15].mxu1 }
 0x142   : > { %v2526_v40 = vpop.f32.mrb[16].mxu0  ;;  %v2528_v41 = vpop.f32.mrb[16].mxu1 }
 0x143   : > { %v2530_v42 = vpop.f32.mrb[17].mxu0  ;;  %v2532_v43 = vpop.f32.mrb[17].mxu1 }
 0x144   : > { %v2534_v44 = vpop.f32.mrb[18].mxu0  ;;  %v2536_v45 = vpop.f32.mrb[18].mxu1 }
 0x145   : > { %v2538_v46 = vpop.f32.mrb[19].mxu0  ;;  %v2540_v47 = vpop.f32.mrb[19].mxu1 }
 0x14a   : > { %v2542_v48 = vpop.f32.mrb[20].mxu0  ;;  %v2544_v49 = vpop.f32.mrb[20].mxu1 }
 0x14b   : > { %v2546_v50 = vpop.f32.mrb[21].mxu0  ;;  %v2548_v51 = vpop.f32.mrb[21].mxu1 }
 0x14c   : > { %v2550_v52 = vpop.f32.mrb[22].mxu0  ;;  %v2552_v53 = vpop.f32.mrb[22].mxu1 }
 0x14d   : > { %v2554_v54 = vpop.f32.mrb[23].mxu0  ;;  %v2556_v55 = vpop.f32.mrb[23].mxu1 }
 0x152   : > { %v2558_v56 = vpop.f32.mrb[24].mxu0  ;;  %v2560_v57 = vpop.f32.mrb[24].mxu1 }
 0x153   : > { %2781 = vst [vmem:[#allocation8_spill] sm:$0xff] %v2558_v56  ;;  %2782 = vst [vmem:[#allocation9_spill] sm:$0xff] %v2560_v57  ;;  %v2562_v58 = vpop.f32.mrb[25].mxu0  ;;  %v2564_v59 = vpop.f32.mrb[25].mxu1 }
 0x154   : > { %2783 = vst [vmem:[#allocation10_spill] sm:$0xff] %v2562_v58  ;;  %2784 = vst [vmem:[#allocation11_spill] sm:$0xff] %v2564_v59  ;;  %v2566_v60 = vpop.f32.mrb[26].mxu0  ;;  %v2568_v61 = vpop.f32.mrb[26].mxu1 }
 0x155   : > { %2785 = vst [vmem:[#allocation12_spill] sm:$0xff] %v2566_v60  ;;  %2786 = vst [vmem:[#allocation13_spill] sm:$0xff] %v2568_v61  ;;  %v2570_v62 = vpop.f32.mrb[27].mxu0  ;;  %v2572_v63 = vpop.f32.mrb[27].mxu1 }
 0x156   : > { %2787 = vst [vmem:[#allocation14_spill] sm:$0xff] %v2570_v62  ;;  %2788 = vst [vmem:[#allocation15_spill] sm:$0xff] %v2572_v63 }
 0x15a   : > { %v2574_v0 = vpop.f32.mrb[28].mxu0  ;;  %v2576_v1 = vpop.f32.mrb[28].mxu1 }
 0x15b   : > { %2789 = vst [vmem:[#allocation16_spill] sm:$0xff] %v2574_v0  ;;  %2790 = vst [vmem:[#allocation17_spill] sm:$0xff] %v2576_v1  ;;  %v2578_v2 = vpop.f32.mrb[29].mxu0  ;;  %v2580_v3 = vpop.f32.mrb[29].mxu1 }
 0x15c   : > { %2791 = vst [vmem:[#allocation18_spill] sm:$0xff] %v2578_v2  ;;  %2792 = vst [vmem:[#allocation19_spill] sm:$0xff] %v2580_v3  ;;  %v2582_v4 = vpop.f32.mrb[30].mxu0  ;;  %v2584_v5 = vpop.f32.mrb[30].mxu1 }
 0x15d   : > { %2793 = vst [vmem:[#allocation20_spill] sm:$0xff] %v2582_v4  ;;  %2794 = vst [vmem:[#allocation21_spill] sm:$0xff] %v2584_v5  ;;  %v2588_v6 = vpop.f32.mrb[31].mxu0  ;;  %v2590_v7 = vpop.f32.mrb[31].mxu1  ;;  %v2597_v5 = vld [vmem:[%s2777_s2] ss:$0 sm:$0xff] }
 0x15e   : > { %2795 = vst [vmem:[#allocation22_spill] sm:$0xff] %v2588_v6  ;;  %2796 = vst [vmem:[#allocation23_spill] sm:$0xff] %v2590_v7 }
 0x162   : > { %v2010_v63 = vpop.f32.mrb[32].mxu0  ;;  %v2074_v62 = vpop.f32.mrb[32].mxu1 }
 0x163   : > { %v1342_v0 = vmax.f32 %v2462_v8, %v2010_v63  ;;  %v1374_v2 = vmax.f32 %v2464_v9, %v2074_v62  ;;  %v957_v1 = vpop.f32.mrb[33].mxu0  ;;  %v1213_v3 = vpop.f32.mrb[33].mxu1 }
 0x164   : > { %v1340_v4 = vmax.f32 %v2466_v10, %v957_v1  ;;  %v1372_v6 = vmax.f32 %v2468_v11, %v1213_v3  ;;  %v2011_v7 = vpop.f32.mrb[34].mxu0  ;;  %v2075_v61 = vpop.f32.mrb[34].mxu1 }
 0x165   : > { %v1406_v60 = vmax.f32 %v1342_v0, %v1374_v2  ;;  %v1343_v59 = vmax.f32 %v2470_v12, %v2011_v7  ;;  %v1375_v8 = vmax.f32 %v2472_v13, %v2075_v61  ;;  %v960_v63 = vpop.f32.mrb[35].mxu0  ;;  %v1216_v9 = vpop.f32.mrb[35].mxu1 }
 0x166   : > { %v1404_v62 = vmax.f32 %v1340_v4, %v1372_v6  ;;  %v1341_v58 = vmax.f32 %v2474_v14, %v960_v63  ;;  %v1373_v57 = vmax.f32 %v2476_v15, %v1216_v9 }
 0x167   : > { %v1445_v56 = vadd.f32 %v2597_v5, %v1406_v60  ;;  %v1407_v10 = vmax.f32 %v1343_v59, %v1375_v8 }
 0x168   : > { %v1443_v11 = vadd.f32 %v2597_v5, %v1404_v62  ;;  %v1405_v1 = vmax.f32 %v1341_v58, %v1373_v57 }
 0x169   : > { %v1477_v3 = vmax.f32 %v1445_v56, 0.0  ;;  %v1446_v0 = vadd.f32 %v2597_v5, %v1407_v10 }
 0x16a   : > { %v1475_v12 = vmax.f32 %v1443_v11, 0.0  ;;  %v1444_v13 = vadd.f32 %v2597_v5, %v1405_v1  ;;  %v2014_v14 = vpop.f32.mrb[36].mxu0  ;;  %v2078_v15 = vpop.f32.mrb[36].mxu1 }
 0x16b   : > { %v1858_v60 = vpack.c.bf16 %v1477_v3, %v1477_v3  ;;  %v1478_v59 = vmax.f32 %v1446_v0, 0.0  ;;  %v1346_v61 = vmax.f32 %v2478_v16, %v2014_v14  ;;  %v1378_v56 = vmax.f32 %v2480_v17, %v2078_v15  ;;  %v973_v57 = vpop.f32.mrb[37].mxu0  ;;  %v1229_v58 = vpop.f32.mrb[37].mxu1 }
 0x16c   : > { %v1856_v2 = vpack.c.bf16 %v1475_v12, %v1475_v12  ;;  %v1476_v4 = vmax.f32 %v1444_v13, 0.0  ;;  %v1344_v6 = vmax.f32 %v2482_v18, %v973_v57  ;;  %v1376_v7 = vmax.f32 %v2484_v19, %v1229_v58  ;;  %v2015_v8 = vpop.f32.mrb[38].mxu0  ;;  %v2079_v63 = vpop.f32.mrb[38].mxu1 }
 0x16d   : > { %1638 = vst.msk [vmem:[%s2611_s27 + $0x8] sm:$0xf] %vm1635_vm0, %v1858_v60  ;;  %v1859_v9 = vpack.c.bf16 %v1478_v59, %v1478_v59  ;;  %v1410_v62 = vmax.f32 %v1346_v61, %v1378_v56  ;;  %v1347_v16 = vmax.f32 %v2486_v20, %v2015_v8  ;;  %v1379_v17 = vmax.f32 %v2488_v21, %v2079_v63  ;;  %v976_v10 = vpop.f32.mrb[39].mxu0  ;;  %v1232_v11 = vpop.f32.mrb[39].mxu1 }
 0x16e   : > { %1636 = vst.msk [vmem:[%s2611_s27] sm:$0xf] %vm1635_vm0, %v1856_v2  ;;  %v1857_v1 = vpack.c.bf16 %v1476_v4, %v1476_v4  ;;  %v1408_v18 = vmax.f32 %v1344_v6, %v1376_v7  ;;  %v1345_v3 = vmax.f32 %v2490_v22, %v976_v10  ;;  %v1377_v19 = vmax.f32 %v2492_v23, %v1232_v11 }
 0x16f   : > { %1639 = vst.msk [vmem:[%s2611_s27 + $0xc] sm:$0xf] %vm1635_vm0, %v1859_v9  ;;  %v1449_v0 = vadd.f32 %v2597_v5, %v1410_v62  ;;  %v1411_v12 = vmax.f32 %v1347_v16, %v1379_v17 }
 0x170   : > { %1637 = vst.msk [vmem:[%s2611_s27 + $0x4] sm:$0xf] %vm1635_vm0, %v1857_v1  ;;  %v1447_v20 = vadd.f32 %v2597_v5, %v1408_v18  ;;  %v1409_v21 = vmax.f32 %v1345_v3, %v1377_v19 }
 0x171   : > { %v1481_v13 = vmax.f32 %v1449_v0, 0.0  ;;  %v1450_v14 = vadd.f32 %v2597_v5, %v1411_v12 }
 0x172   : > { %v1479_v15 = vmax.f32 %v1447_v20, 0.0  ;;  %v1448_v60 = vadd.f32 %v2597_v5, %v1409_v21  ;;  %v2018_v22 = vpop.f32.mrb[40].mxu0  ;;  %v2082_v59 = vpop.f32.mrb[40].mxu1 }
 0x173   : > { %v1862_v23 = vpack.c.bf16 %v1481_v13, %v1481_v13  ;;  %v1482_v61 = vmax.f32 %v1450_v14, 0.0  ;;  %v1350_v56 = vmax.f32 %v2494_v24, %v2018_v22  ;;  %v1382_v57 = vmax.f32 %v2496_v25, %v2082_v59  ;;  %v989_v58 = vpop.f32.mrb[41].mxu0  ;;  %v1245_v2 = vpop.f32.mrb[41].mxu1 }
 0x174   : > { %v1860_v4 = vpack.c.bf16 %v1479_v15, %v1479_v15  ;;  %v1480_v6 = vmax.f32 %v1448_v60, 0.0  ;;  %v1348_v7 = vmax.f32 %v2498_v26, %v989_v58  ;;  %v1380_v8 = vmax.f32 %v2500_v27, %v1245_v2  ;;  %v2019_v63 = vpop.f32.mrb[42].mxu0  ;;  %v2083_v9 = vpop.f32.mrb[42].mxu1 }
 0x175   : > { %1642 = vst.msk [vmem:[%s2611_s27 + $0x18] sm:$0xf] %vm1635_vm0, %v1862_v23  ;;  %v1863_v62 = vpack.c.bf16 %v1482_v61, %v1482_v61  ;;  %v1414_v16 = vmax.f32 %v1350_v56, %v1382_v57  ;;  %v1351_v24 = vmax.f32 %v2502_v28, %v2019_v63  ;;  %v1383_v25 = vmax.f32 %v2504_v29, %v2083_v9  ;;  %v992_v17 = vpop.f32.mrb[43].mxu0  ;;  %v1248_v10 = vpop.f32.mrb[43].mxu1 }
 0x176   : > { %1640 = vst.msk [vmem:[%s2611_s27 + $0x10] sm:$0xf] %vm1635_vm0, %v1860_v4  ;;  %v1861_v11 = vpack.c.bf16 %v1480_v6, %v1480_v6  ;;  %v1412_v26 = vmax.f32 %v1348_v7, %v1380_v8  ;;  %v1349_v1 = vmax.f32 %v2506_v30, %v992_v17  ;;  %v1381_v27 = vmax.f32 %v2508_v31, %v1248_v10 }
 0x177   : > { %1643 = vst.msk [vmem:[%s2611_s27 + $0x1c] sm:$0xf] %vm1635_vm0, %v1863_v62  ;;  %v1453_v18 = vadd.f32 %v2597_v5, %v1414_v16  ;;  %v1415_v3 = vmax.f32 %v1351_v24, %v1383_v25 }
 0x178   : > { %1641 = vst.msk [vmem:[%s2611_s27 + $0x14] sm:$0xf] %vm1635_vm0, %v1861_v11  ;;  %v1451_v28 = vadd.f32 %v2597_v5, %v1412_v26  ;;  %v1413_v29 = vmax.f32 %v1349_v1, %v1381_v27 }
 0x179   : > { %v1485_v19 = vmax.f32 %v1453_v18, 0.0  ;;  %v1454_v0 = vadd.f32 %v2597_v5, %v1415_v3 }
 0x17a   : > { %v1483_v12 = vmax.f32 %v1451_v28, 0.0  ;;  %v1452_v20 = vadd.f32 %v2597_v5, %v1413_v29  ;;  %v2022_v30 = vpop.f32.mrb[44].mxu0  ;;  %v2086_v21 = vpop.f32.mrb[44].mxu1 }
 0x17b   : > { %v1866_v31 = vpack.c.bf16 %v1485_v19, %v1485_v19  ;;  %v1486_v13 = vmax.f32 %v1454_v0, 0.0  ;;  %v1354_v14 = vmax.f32 %v2510_v32, %v2022_v30  ;;  %v1386_v15 = vmax.f32 %v2512_v33, %v2086_v21  ;;  %v1005_v60 = vpop.f32.mrb[45].mxu0  ;;  %v1261_v22 = vpop.f32.mrb[45].mxu1 }
 0x17c   : > { %v1864_v59 = vpack.c.bf16 %v1483_v12, %v1483_v12  ;;  %v1484_v23 = vmax.f32 %v1452_v20, 0.0  ;;  %v1352_v61 = vmax.f32 %v2514_v34, %v1005_v60  ;;  %v1384_v56 = vmax.f32 %v2516_v35, %v1261_v22  ;;  %v2023_v57 = vpop.f32.mrb[46].mxu0  ;;  %v2087_v58 = vpop.f32.mrb[46].mxu1 }
 0x17d   : > { %1646 = vst.msk [vmem:[%s2611_s27 + $0x28] sm:$0xf] %vm1635_vm0, %v1866_v31  ;;  %v1867_v2 = vpack.c.bf16 %v1486_v13, %v1486_v13  ;;  %v1418_v4 = vmax.f32 %v1354_v14, %v1386_v15  ;;  %v1355_v32 = vmax.f32 %v2518_v36, %v2023_v57  ;;  %v1387_v33 = vmax.f32 %v2520_v37, %v2087_v58  ;;  %v1008_v6 = vpop.f32.mrb[47].mxu0  ;;  %v1264_v7 = vpop.f32.mrb[47].mxu1 }
 0x17e   : > { %1644 = vst.msk [vmem:[%s2611_s27 + $0x20] sm:$0xf] %vm1635_vm0, %v1864_v59  ;;  %v1865_v8 = vpack.c.bf16 %v1484_v23, %v1484_v23  ;;  %v1416_v34 = vmax.f32 %v1352_v61, %v1384_v56  ;;  %v1353_v63 = vmax.f32 %v2522_v38, %v1008_v6  ;;  %v1385_v35 = vmax.f32 %v2524_v39, %v1264_v7 }
 0x17f   : > { %1647 = vst.msk [vmem:[%s2611_s27 + $0x2c] sm:$0xf] %vm1635_vm0, %v1867_v2  ;;  %v1457_v9 = vadd.f32 %v2597_v5, %v1418_v4  ;;  %v1419_v62 = vmax.f32 %v1355_v32, %v1387_v33 }
 0x180   : > { %1645 = vst.msk [vmem:[%s2611_s27 + $0x24] sm:$0xf] %vm1635_vm0, %v1865_v8  ;;  %v1455_v36 = vadd.f32 %v2597_v5, %v1416_v34  ;;  %v1417_v37 = vmax.f32 %v1353_v63, %v1385_v35 }
 0x181   : > { %v1489_v16 = vmax.f32 %v1457_v9, 0.0  ;;  %v1458_v24 = vadd.f32 %v2597_v5, %v1419_v62 }
 0x182   : > { %v1487_v25 = vmax.f32 %v1455_v36, 0.0  ;;  %v1456_v17 = vadd.f32 %v2597_v5, %v1417_v37  ;;  %v2026_v38 = vpop.f32.mrb[48].mxu0  ;;  %v2090_v10 = vpop.f32.mrb[48].mxu1 }
 0x183   : > { %v1870_v39 = vpack.c.bf16 %v1489_v16, %v1489_v16  ;;  %v1490_v11 = vmax.f32 %v1458_v24, 0.0  ;;  %v1358_v26 = vmax.f32 %v2526_v40, %v2026_v38  ;;  %v1390_v1 = vmax.f32 %v2528_v41, %v2090_v10  ;;  %v1021_v27 = vpop.f32.mrb[49].mxu0  ;;  %v1277_v18 = vpop.f32.mrb[49].mxu1 }
 0x184   : > { %v1868_v3 = vpack.c.bf16 %v1487_v25, %v1487_v25  ;;  %v1488_v28 = vmax.f32 %v1456_v17, 0.0  ;;  %v1356_v29 = vmax.f32 %v2530_v42, %v1021_v27  ;;  %v1388_v19 = vmax.f32 %v2532_v43, %v1277_v18  ;;  %v2027_v0 = vpop.f32.mrb[50].mxu0  ;;  %v2091_v12 = vpop.f32.mrb[50].mxu1  ;;  %v2798_v18 = vld [vmem:[#allocation9_spill] sm:$0xff] }
 0x185   : > { %1650 = vst.msk [vmem:[%s2611_s27 + $0x38] sm:$0xf] %vm1635_vm0, %v1870_v39  ;;  %v1871_v20 = vpack.c.bf16 %v1490_v11, %v1490_v11  ;;  %v1422_v30 = vmax.f32 %v1358_v26, %v1390_v1  ;;  %v1359_v40 = vmax.f32 %v2534_v44, %v2027_v0  ;;  %v1391_v41 = vmax.f32 %v2536_v45, %v2091_v12  ;;  %v1024_v21 = vpop.f32.mrb[51].mxu0  ;;  %v1280_v31 = vpop.f32.mrb[51].mxu1  ;;  %v2797_v1 = vld [vmem:[#allocation8_spill] sm:$0xff]  ;;  %v2799_v12 = vld [vmem:[#allocation10_spill] sm:$0xff] }
 0x186   : > { %1648 = vst.msk [vmem:[%s2611_s27 + $0x30] sm:$0xf] %vm1635_vm0, %v1868_v3  ;;  %v1869_v13 = vpack.c.bf16 %v1488_v28, %v1488_v28  ;;  %v1420_v42 = vmax.f32 %v1356_v29, %v1388_v19  ;;  %v1357_v14 = vmax.f32 %v2538_v46, %v1024_v21  ;;  %v1389_v43 = vmax.f32 %v2540_v47, %v1280_v31 }
 0x187   : > { %1651 = vst.msk [vmem:[%s2611_s27 + $0x3c] sm:$0xf] %vm1635_vm0, %v1871_v20  ;;  %v1461_v15 = vadd.f32 %v2597_v5, %v1422_v30  ;;  %v1423_v60 = vmax.f32 %v1359_v40, %v1391_v41  ;;  %v2800_v30 = vld [vmem:[#allocation11_spill] sm:$0xff] }
 0x188   : > { %1649 = vst.msk [vmem:[%s2611_s27 + $0x34] sm:$0xf] %vm1635_vm0, %v1869_v13  ;;  %v1459_v44 = vadd.f32 %v2597_v5, %v1420_v42  ;;  %v1421_v45 = vmax.f32 %v1357_v14, %v1389_v43  ;;  %v2801_v42 = vld [vmem:[#allocation12_spill] sm:$0xff]  ;;  %v2802_v43 = vld [vmem:[#allocation13_spill] sm:$0xff] }
 0x189   : > { %v1493_v22 = vmax.f32 %v1461_v15, 0.0  ;;  %v1462_v59 = vadd.f32 %v2597_v5, %v1423_v60 }
 0x18a   : > { %v1491_v23 = vmax.f32 %v1459_v44, 0.0  ;;  %v1460_v61 = vadd.f32 %v2597_v5, %v1421_v45  ;;  %v2030_v46 = vpop.f32.mrb[52].mxu0  ;;  %v2094_v56 = vpop.f32.mrb[52].mxu1 }
 0x18b   : > { %v1874_v47 = vpack.c.bf16 %v1493_v22, %v1493_v22  ;;  %v1494_v57 = vmax.f32 %v1462_v59, 0.0  ;;  %v1362_v58 = vmax.f32 %v2542_v48, %v2030_v46  ;;  %v1394_v2 = vmax.f32 %v2544_v49, %v2094_v56  ;;  %v1037_v4 = vpop.f32.mrb[53].mxu0  ;;  %v1293_v32 = vpop.f32.mrb[53].mxu1  ;;  %v2803_v59 = vld [vmem:[#allocation14_spill] sm:$0xff] }
 0x18c   : > { %v1872_v33 = vpack.c.bf16 %v1491_v23, %v1491_v23  ;;  %v1492_v6 = vmax.f32 %v1460_v61, 0.0  ;;  %v1360_v7 = vmax.f32 %v2546_v50, %v1037_v4  ;;  %v1392_v8 = vmax.f32 %v2548_v51, %v1293_v32  ;;  %v2031_v34 = vpop.f32.mrb[54].mxu0  ;;  %v2095_v63 = vpop.f32.mrb[54].mxu1  ;;  %v2804_v61 = vld [vmem:[#allocation15_spill] sm:$0xff] }
 0x18d   : > { %1654 = vst.msk [vmem:[%s2611_s27 + $0x48] sm:$0xf] %vm1635_vm0, %v1874_v47  ;;  %v1875_v35 = vpack.c.bf16 %v1494_v57, %v1494_v57  ;;  %v1426_v9 = vmax.f32 %v1362_v58, %v1394_v2  ;;  %v1363_v48 = vmax.f32 %v2550_v52, %v2031_v34  ;;  %v1395_v49 = vmax.f32 %v2552_v53, %v2095_v63  ;;  %v1040_v62 = vpop.f32.mrb[55].mxu0  ;;  %v1296_v36 = vpop.f32.mrb[55].mxu1  ;;  %v2805_v63 = vld [vmem:[#allocation16_spill] sm:$0xff] }
 0x18e   : > { %1652 = vst.msk [vmem:[%s2611_s27 + $0x40] sm:$0xf] %vm1635_vm0, %v1872_v33  ;;  %v1873_v37 = vpack.c.bf16 %v1492_v6, %v1492_v6  ;;  %v1424_v50 = vmax.f32 %v1360_v7, %v1392_v8  ;;  %v1361_v16 = vmax.f32 %v2554_v54, %v1040_v62  ;;  %v1393_v51 = vmax.f32 %v2556_v55, %v1296_v36 }
 0x18f   : > { %1655 = vst.msk [vmem:[%s2611_s27 + $0x4c] sm:$0xf] %vm1635_vm0, %v1875_v35  ;;  %v1465_v24 = vadd.f32 %v2597_v5, %v1426_v9  ;;  %v1427_v25 = vmax.f32 %v1363_v48, %v1395_v49  ;;  %v2806_v9 = vld [vmem:[#allocation17_spill] sm:$0xff] }
 0x190   : > { %1653 = vst.msk [vmem:[%s2611_s27 + $0x44] sm:$0xf] %vm1635_vm0, %v1873_v37  ;;  %v1463_v52 = vadd.f32 %v2597_v5, %v1424_v50  ;;  %v1425_v53 = vmax.f32 %v1361_v16, %v1393_v51  ;;  %v2807_v50 = vld [vmem:[#allocation18_spill] sm:$0xff]  ;;  %v2808_v51 = vld [vmem:[#allocation19_spill] sm:$0xff] }
 0x191   : > { %v1497_v17 = vmax.f32 %v1465_v24, 0.0  ;;  %v1466_v38 = vadd.f32 %v2597_v5, %v1427_v25 }
 0x192   : > { %v1495_v10 = vmax.f32 %v1463_v52, 0.0  ;;  %v1464_v39 = vadd.f32 %v2597_v5, %v1425_v53  ;;  %v2034_v54 = vpop.f32.mrb[56].mxu0  ;;  %v2098_v11 = vpop.f32.mrb[56].mxu1 }
 0x193   : > { %v1878_v55 = vpack.c.bf16 %v1497_v17, %v1497_v17  ;;  %v1498_v26 = vmax.f32 %v1466_v38, 0.0  ;;  %v1366_v27 = vmax.f32 %v2797_v1, %v2034_v54  ;;  %v1398_v3 = vmax.f32 %v2798_v18, %v2098_v11  ;;  %v1053_v28 = vpop.f32.mrb[57].mxu0  ;;  %v1309_v29 = vpop.f32.mrb[57].mxu1  ;;  %v2809_v38 = vld [vmem:[#allocation20_spill] sm:$0xff] }
 0x194   : > { %v1876_v19 = vpack.c.bf16 %v1495_v10, %v1495_v10  ;;  %v1496_v0 = vmax.f32 %v1464_v39, 0.0  ;;  %v1364_v20 = vmax.f32 %v2799_v12, %v1053_v28  ;;  %v1396_v40 = vmax.f32 %v2800_v30, %v1309_v29  ;;  %v2035_v41 = vpop.f32.mrb[58].mxu0  ;;  %v2099_v21 = vpop.f32.mrb[58].mxu1  ;;  %v2810_v39 = vld [vmem:[#allocation21_spill] sm:$0xff] }
 0x195   : > { %1658 = vst.msk [vmem:[%s2611_s27 + $0x58] sm:$0xf] %vm1635_vm0, %v1878_v55  ;;  %v1879_v31 = vpack.c.bf16 %v1498_v26, %v1498_v26  ;;  %v1430_v13 = vmax.f32 %v1366_v27, %v1398_v3  ;;  %v1367_v14 = vmax.f32 %v2801_v42, %v2035_v41  ;;  %v1399_v15 = vmax.f32 %v2802_v43, %v2099_v21  ;;  %v1056_v60 = vpop.f32.mrb[59].mxu0  ;;  %v1312_v44 = vpop.f32.mrb[59].mxu1  ;;  %v2811_v27 = vld [vmem:[#allocation22_spill] sm:$0xff]  ;;  %v2812_v3 = vld [vmem:[#allocation23_spill] sm:$0xff] }
 0x196   : > { %1656 = vst.msk [vmem:[%s2611_s27 + $0x50] sm:$0xf] %vm1635_vm0, %v1876_v19  ;;  %v1877_v45 = vpack.c.bf16 %v1496_v0, %v1496_v0  ;;  %v1428_v22 = vmax.f32 %v1364_v20, %v1396_v40  ;;  %v1365_v23 = vmax.f32 %v2803_v59, %v1056_v60  ;;  %v1397_v46 = vmax.f32 %v2804_v61, %v1312_v44 }
 0x197   : > { %1659 = vst.msk [vmem:[%s2611_s27 + $0x5c] sm:$0xf] %vm1635_vm0, %v1879_v31  ;;  %v1469_v56 = vadd.f32 %v2597_v5, %v1430_v13  ;;  %v1431_v47 = vmax.f32 %v1367_v14, %v1399_v15 }
 0x198   : > { %1657 = vst.msk [vmem:[%s2611_s27 + $0x54] sm:$0xf] %vm1635_vm0, %v1877_v45  ;;  %v1467_v57 = vadd.f32 %v2597_v5, %v1428_v22  ;;  %v1429_v58 = vmax.f32 %v1365_v23, %v1397_v46 }
 0x199   : > { %v1501_v2 = vmax.f32 %v1469_v56, 0.0  ;;  %v1470_v4 = vadd.f32 %v2597_v5, %v1431_v47 }
 0x19a   : > { %v1499_v32 = vmax.f32 %v1467_v57, 0.0  ;;  %v1468_v33 = vadd.f32 %v2597_v5, %v1429_v58  ;;  %v2038_v6 = vpop.f32.mrb[60].mxu0  ;;  %v2102_v7 = vpop.f32.mrb[60].mxu1 }
 0x19b   : > { %v1882_v8 = vpack.c.bf16 %v1501_v2, %v1501_v2  ;;  %v1502_v34 = vmax.f32 %v1470_v4, 0.0  ;;  %v1370_v35 = vmax.f32 %v2805_v63, %v2038_v6  ;;  %v1402_v48 = vmax.f32 %v2806_v9, %v2102_v7  ;;  %v1069_v49 = vpop.f32.mrb[61].mxu0  ;;  %v1325_v62 = vpop.f32.mrb[61].mxu1 }
 0x19c   : > { %v1880_v36 = vpack.c.bf16 %v1499_v32, %v1499_v32  ;;  %v1500_v37 = vmax.f32 %v1468_v33, 0.0  ;;  %v1368_v16 = vmax.f32 %v2807_v50, %v1069_v49  ;;  %v1400_v24 = vmax.f32 %v2808_v51, %v1325_v62  ;;  %v2039_v25 = vpop.f32.mrb[62].mxu0  ;;  %v2103_v52 = vpop.f32.mrb[62].mxu1 }
 0x19d   : > { %1662 = vst.msk [vmem:[%s2611_s27 + $0x68] sm:$0xf] %vm1635_vm0, %v1882_v8  ;;  %v1883_v53 = vpack.c.bf16 %v1502_v34, %v1502_v34  ;;  %v1434_v17 = vmax.f32 %v1370_v35, %v1402_v48  ;;  %v1371_v10 = vmax.f32 %v2809_v38, %v2039_v25  ;;  %v1403_v54 = vmax.f32 %v2810_v39, %v2103_v52  ;;  %v1072_v11 = vpop.f32.mrb[63].mxu0  ;;  %v1328_v55 = vpop.f32.mrb[63].mxu1 }
 0x19e   : > { %1660 = vst.msk [vmem:[%s2611_s27 + $0x60] sm:$0xf] %vm1635_vm0, %v1880_v36  ;;  %v1881_v26 = vpack.c.bf16 %v1500_v37, %v1500_v37  ;;  %v1432_v1 = vmax.f32 %v1368_v16, %v1400_v24  ;;  %v1369_v18 = vmax.f32 %v2811_v27, %v1072_v11  ;;  %v1401_v28 = vmax.f32 %v2812_v3, %v1328_v55 }
 0x19f   : > { %1663 = vst.msk [vmem:[%s2611_s27 + $0x6c] sm:$0xf] %vm1635_vm0, %v1883_v53  ;;  %v1473_v29 = vadd.f32 %v2597_v5, %v1434_v17  ;;  %v1435_v19 = vmax.f32 %v1371_v10, %v1403_v54 }
 0x1a0   : > { %1661 = vst.msk [vmem:[%s2611_s27 + $0x64] sm:$0xf] %vm1635_vm0, %v1881_v26  ;;  %v1471_v0 = vadd.f32 %v2597_v5, %v1432_v1  ;;  %v1433_v12 = vmax.f32 %v1369_v18, %v1401_v28 }
 0x1a1   : > { %v1505_v20 = vmax.f32 %v1473_v29, 0.0  ;;  %v1474_v30 = vadd.f32 %v2597_v5, %v1435_v19 }
 0x1a2   : > { %v1503_v40 = vmax.f32 %v1471_v0, 0.0  ;;  %v1472_v41 = vadd.f32 %v2597_v5, %v1433_v12 }
 0x1a3   : > { %v1886_v21 = vpack.c.bf16 %v1505_v20, %v1505_v20  ;;  %v1506_v31 = vmax.f32 %v1474_v30, 0.0 }
 0x1a4   : > { %v1884_v13 = vpack.c.bf16 %v1503_v40, %v1503_v40  ;;  %v1504_v42 = vmax.f32 %v1472_v41, 0.0 }
 0x1a5   : > { %1666 = vst.msk [vmem:[%s2611_s27 + $0x78] sm:$0xf] %vm1635_vm0, %v1886_v21  ;;  %v1887_v14 = vpack.c.bf16 %v1506_v31, %v1506_v31 }
 0x1a6   : > { %1664 = vst.msk [vmem:[%s2611_s27 + $0x70] sm:$0xf] %vm1635_vm0, %v1884_v13  ;;  %v1885_v43 = vpack.c.bf16 %v1504_v42, %v1504_v42 }
 0x1a7   : > { %1667 = vst.msk [vmem:[%s2611_s27 + $0x7c] sm:$0xf] %vm1635_vm0, %v1887_v14 }
 0x1a8   : > { %1665 = vst.msk [vmem:[%s2611_s27 + $0x74] sm:$0xf] %vm1635_vm0, %v1885_v43 }
 0x1a9 PF: > { %p13_p12 = scmp.ge.s32.totalorder %s2321_s17, 4   ;;  %s2813_s12 = smov %s2265_s13 }
 0x1aa   : > { %s2814_s13 = smov %s2269_s14  ;;  %s2815_s14 = smov %s2331_s20 }
 0x1ab   : > { %s2816_s15 = smov %s2321_s17  ;;  %15 = sbr.rel (!%p13_p12) target bundleno = 3 (0x3), region = 77 }
 0x1b2   :  { %1690 = vsyncpa [#allocation3], 1 }
 0x1b3   :  { %1692 = vsyncpa [#allocation3 + $0x1], 1 }

</bundles_post_ra>
